<compile_context>
chip_gen: v5e
topology: v5e:2x2
jax: 0.10.0
libtpu: 0.0.40
codegen_flags: <defaults>
</compile_context>

<pallas_src>
import functools

import jax
import jax.numpy as jnp
from jax import lax
from jax.experimental import pallas as pl
from jax.experimental.pallas import tpu as pltpu


# --------------------------------------------------------------------------- #
# helpers
# --------------------------------------------------------------------------- #
def _round_up(v, m):
    return -(-v // m) * m


def _vmem_budget_bytes():
    """Physical VMEM per TensorCore minus compiler headroom."""
    try:
        cap = int(pltpu.get_tpu_info().vmem_capacity_bytes)
    except Exception:
        cap = 64 << 20                      # most conservative current part (v7x)
    return max(16 << 20, cap - (8 << 20))


def _has_bf16_valu():
    """v6e/v7x have a bf16 VALU; v5e and older do not (keep the f32 gate there)."""
    try:
        info = pltpu.get_tpu_info()
    except Exception:
        return True                         # bf16 math is compile-safe everywhere
    name = ""
    for attr in ("chip_version", "version", "chip", "name"):
        v = getattr(info, attr, None)
        if v is not None:
            name += " " + (getattr(v, "name", None) or str(v))
    name = name.lower()
    return not any(tag in name for tag in ("v2", "v3", "v4", "v5"))


def _excite(pooled_f32, w1, w2, shift_f32):
    """(C,1) f32 pooled mean -> (C,1) f32 hard-sigmoid attention (f32 accumulation)."""
    h = jnp.dot(w1, pooled_f32.astype(w1.dtype), preferred_element_type=jnp.float32)
    h = jnp.maximum(h + shift_f32, 0.0)
    a = jnp.dot(w2, h.astype(w2.dtype), preferred_element_type=jnp.float32)
    return jnp.clip(a + 3.0, 0.0, 6.0) * (1.0 / 6.0)


# --------------------------------------------------------------------------- #
# kernels
# --------------------------------------------------------------------------- #
def _se_fused_kernel(x_ref, ones_ref, w1_ref, w2_ref, shift_ref, o_ref, *,
                     inv_hw, gate_dtype):
    # Spatial mean via MXU ones-matmul with f32 accumulation.
    pooled = jnp.dot(x_ref[0], ones_ref[...],
                     preferred_element_type=jnp.float32) * inv_hw           # (C,1)
    atten = _excite(pooled, w1_ref[...], w2_ref[...], shift_ref[...])        # (C,1)
    xv = x_ref[...].astype(gate_dtype)
    o_ref[...] = (xv * atten.astype(gate_dtype)[None, :, :]).astype(o_ref.dtype)


def _se_pool_excite_kernel(x_ref, ones_ref, w1_ref, w2_ref, shift_ref,
                           atten_ref, sum_ref, *, hw, tile_hw, inv_hw):
    t = pl.program_id(1)

    @pl.when(t == 0)
    def _():
        sum_ref[...] = jnp.zeros_like(sum_ref)

    # Zero lanes past the true spatial extent (ragged tail tile): the padded
    # region's contents are unspecified.  For divisible HW the mask is all-true
    # and this is one cheap select hidden under the DMA.
    x2d = x_ref[0]                                                    # (C, tile_hw)
    col = lax.broadcasted_iota(jnp.int32, x2d.shape, 1)
    x2d = jnp.where(col < (hw - t * tile_hw), x2d, jnp.zeros_like(x2d))
    sum_ref[...] += jnp.dot(x2d, ones_ref[...],
                            preferred_element_type=jnp.float32)       # (C,1) f32

    @pl.when(t == pl.num_programs(1) - 1)
    def _():
        pooled = sum_ref[...] * inv_hw
        atten_ref[...] = _excite(pooled, w1_ref[...], w2_ref[...],
                                 shift_ref[...])[None, :, :]           # (1,C,1)


def _se_gate_kernel(x_ref, atten_ref, o_ref, *, gate_dtype):
    a = atten_ref[...].astype(gate_dtype)                              # (1,C,1)
    o_ref[...] = (x_ref[...].astype(gate_dtype) * a).astype(o_ref.dtype)
    # (Out-of-bounds lanes of a ragged tail tile are clipped on writeback.)


# --------------------------------------------------------------------------- #
# wrapper
# --------------------------------------------------------------------------- #
def se_layer_pallas(x_nchw, w1, w2, gamma, beta, running_mean, running_var,
                    eps=1e-5, force_path=None):
    """x_nchw: (N, C, H, W); w1: (C//4, C); w2: (C, C//4); BN params: (C//4,)."""
    N, C, H, W = x_nchw.shape
    Cr = w1.shape[0]
    HW = H * W
    itemsize = x_nchw.dtype.itemsize

    x3 = x_nchw.reshape(N, C, HW)                      # no pad, no slice

    # Fold eval-mode BatchNorm2d into the first 1x1 conv.
    scale = gamma / jnp.sqrt(running_var + eps)                        # (Cr,)
    w_dtype = jnp.bfloat16 if x_nchw.dtype == jnp.bfloat16 else jnp.float32
    w1_f = (w1 * scale[:, None]).astype(w_dtype)                       # (Cr, C)
    w2_f = w2.astype(w_dtype)                                          # (C, Cr)
    shift = (beta - running_mean * scale).reshape(Cr, 1).astype(jnp.float32)

    gate_dtype = (jnp.bfloat16
                  if (x_nchw.dtype == jnp.bfloat16 and _has_bf16_valu())
                  else jnp.float32)

    budget = _vmem_budget_bytes()
    c_pad = _round_up(C, 8)
    w_bytes = ((w1_f.size + w2_f.size) * jnp.dtype(w_dtype).itemsize
               + shift.size * 4)

    # ---- fused-path VMEM footprint (double-buffered in/out + lane-padded ones)
    fused_blk = c_pad * _round_up(HW, 128) * itemsize
    ones_fused = _round_up(HW, 8) * 128 * itemsize
    fused_need = 4 * fused_blk + 2 * ones_fused + 2 * w_bytes + (2 << 20)
    fused_fits = fused_need <= budget

    # ---- HW tile for the two-pass path: >= 128 lanes, capped by a per-tile
    #      byte budget, and small enough to give ~8 pipeline steps total.
    max_tile_bytes = 4 << 20
    lanes_cap = max(128, (max_tile_bytes // max(1, C * itemsize)) // 128 * 128)
    want_nt = max(2, -(-8 // max(1, N)))
    thw = max(128, min(lanes_cap, _round_up(max(1, -(-HW // want_nt)), 128)))
    nt = -(-HW // thw)

    if force_path == "fused":
        use_tiled = False
    elif force_path == "tiled":
        use_tiled = True
    else:
        use_tiled = ((not fused_fits) or N < 4) and nt >= 2

    # ------------------------------------------------------------------ fused
    if not use_tiled:
        ones_col = jnp.ones((HW, 1), dtype=x3.dtype)
        kernel = functools.partial(_se_fused_kernel, inv_hw=1.0 / HW,
                                   gate_dtype=gate_dtype)
        out3 = pl.pallas_call(
            kernel,
            out_shape=jax.ShapeDtypeStruct((N, C, HW), x3.dtype),
            grid_spec=pltpu.PrefetchScalarGridSpec(
                num_scalar_prefetch=0,
                grid=(N,),
                in_specs=[
                    pl.BlockSpec((1, C, HW), lambda n: (n, 0, 0)),
                    pl.BlockSpec((HW, 1), lambda n: (0, 0)),
                    pl.BlockSpec((Cr, C), lambda n: (0, 0)),
                    pl.BlockSpec((C, Cr), lambda n: (0, 0)),
                    pl.BlockSpec((Cr, 1), lambda n: (0, 0)),
                ],
                out_specs=pl.BlockSpec((1, C, HW), lambda n: (n, 0, 0)),
            ),
            compiler_params=pltpu.CompilerParams(
                dimension_semantics=("parallel",),
                vmem_limit_bytes=int(min(budget, max(fused_need, 32 << 20)))),
        )(x3, ones_col, w1_f, w2_f, shift)
        return out3.reshape(N, C, H, W)

    # ------------------------------------------------------------------ tiled
    # Pass 1: pooled mean + excite -> per-sample channel gates (tiny f32 tensor).
    ones_col = jnp.ones((thw, 1), dtype=x3.dtype)
    pool_blk = c_pad * thw * itemsize
    pool_need = (2 * pool_blk + 2 * (_round_up(thw, 8) * 128 * itemsize)
                 + 2 * w_bytes + (2 << 20))
    pool_kernel = functools.partial(_se_pool_excite_kernel,
                                    hw=HW, tile_hw=thw, inv_hw=1.0 / HW)
    atten = pl.pallas_call(
        pool_kernel,
        out_shape=jax.ShapeDtypeStruct((N, C, 1), jnp.float32),
        grid_spec=pltpu.PrefetchScalarGridSpec(
            num_scalar_prefetch=0,
            grid=(N, nt),
            in_specs=[
                pl.BlockSpec((1, C, thw), lambda n, t: (n, 0, t)),
                pl.BlockSpec((thw, 1), lambda n, t: (0, 0)),
                pl.BlockSpec((Cr, C), lambda n, t: (0, 0)),
                pl.BlockSpec((C, Cr), lambda n, t: (0, 0)),
                pl.BlockSpec((Cr, 1), lambda n, t: (0, 0)),
            ],
            out_specs=pl.BlockSpec((1, C, 1), lambda n, t: (n, 0, 0)),
            scratch_shapes=[pltpu.VMEM((C, 1), jnp.float32)],
        ),
        compiler_params=pltpu.CompilerParams(
            dimension_semantics=("parallel", "arbitrary"),
            vmem_limit_bytes=int(min(budget, max(pool_need, 32 << 20)))),
    )(x3, ones_col, w1_f, w2_f, shift)

    # Pass 2: elementwise gate, fully parallel over (N, HW tiles).
    gate_need = 4 * pool_blk + (2 << 20)
    gate_kernel = functools.partial(_se_gate_kernel, gate_dtype=gate_dtype)
    out3 = pl.pallas_call(
        gate_kernel,
        out_shape=jax.ShapeDtypeStruct((N, C, HW), x3.dtype),
        grid_spec=pltpu.PrefetchScalarGridSpec(
            num_scalar_prefetch=0,
            grid=(N, nt),
            in_specs=[
                pl.BlockSpec((1, C, thw), lambda n, t: (n, 0, t)),
                pl.BlockSpec((1, C, 1), lambda n, t: (n, 0, 0)),
            ],
            out_specs=pl.BlockSpec((1, C, thw), lambda n, t: (n, 0, t)),
        ),
        compiler_params=pltpu.CompilerParams(
            dimension_semantics=("parallel", "parallel"),
            vmem_limit_bytes=int(min(budget, max(gate_need, 32 << 20)))),
    )(x3, atten)
    return out3.reshape(N, C, H, W)


# --------------------------------------------------------------------------- #
# pure-JAX f32 reference of the PyTorch forward (eval-mode BN)
# --------------------------------------------------------------------------- #
def se_layer_ref(x_nchw, w1, w2, gamma, beta, running_mean, running_var, eps=1e-5):
    x = x_nchw.astype(jnp.float32)
    pooled = jnp.mean(x, axis=(2, 3))                 # (N, C)
    h = pooled @ w1.T                                 # (N, C//4)
    h = (h - running_mean) / jnp.sqrt(running_var + eps) * gamma + beta
    h = jnp.maximum(h, 0.0)
    atten = h @ w2.T                                  # (N, C)
    atten = jnp.clip(atten + 3.0, 0.0, 6.0) / 6.0
    return x * atten[:, :, None, None]


if __name__ == "__main__":
    N, C, H, W = 2, 8, 16, 16
    Cr = C // 4

    key = jax.random.PRNGKey(0)
    kx, k1, k2, kg, kb, km, kv = jax.random.split(key, 7)

    x = jax.random.normal(kx, (N, C, H, W), dtype=jnp.float32).astype(jnp.bfloat16)
    w1 = jax.random.normal(k1, (Cr, C), dtype=jnp.float32) * 0.1
    w2 = jax.random.normal(k2, (C, Cr), dtype=jnp.float32) * 0.1
    gamma = 1.0 + 0.1 * jax.random.normal(kg, (Cr,), dtype=jnp.float32)
    beta = 0.1 * jax.random.normal(kb, (Cr,), dtype=jnp.float32)
    running_mean = 0.1 * jax.random.normal(km, (Cr,), dtype=jnp.float32)
    running_var = 1.0 + 0.1 * jax.random.uniform(kv, (Cr,), dtype=jnp.float32)

    ref = se_layer_ref(x, w1, w2, gamma, beta, running_mean, running_var)

    def _check(out, name):
        out = jax.block_until_ready(out)
        assert out.shape == (N, C, H, W), name
        assert out.dtype == x.dtype, name
        out_f32 = out.astype(jnp.float32)
        err = float(jnp.max(jnp.abs(out_f32 - ref)))
        assert jnp.allclose(out_f32, ref, atol=2e-2, rtol=2e-2), (
            f"{name}: mismatch vs reference, max abs err = {err}")

    # Default path at this shape (N=2): the two-pass tiled kernels.
    _check(se_layer_pallas(x, w1, w2, gamma, beta, running_mean, running_var),
           "tiled")
    # Also verify the fused single-kernel path.
    _check(se_layer_pallas(x, w1, w2, gamma, beta, running_mean, running_var,
                           force_path="fused"),
           "fused")

    print("KERNEL_OK")
</pallas_src>

<mosaic_0001>
module attributes {stable_mosaic.version = 11 : i64} {
  func.func @_se_pool_excite_kernel(%arg0: i32, %arg1: i32, %arg2: memref<1x8x128xbf16, #tpu.memory_space<vmem>>, %arg3: memref<128x1xbf16, #tpu.memory_space<vmem>>, %arg4: memref<2x8xbf16, #tpu.memory_space<vmem>>, %arg5: memref<8x2xbf16, #tpu.memory_space<vmem>>, %arg6: memref<2x1xf32, #tpu.memory_space<vmem>>, %arg7: memref<1x8x1xf32, #tpu.memory_space<vmem>>, %arg8: memref<8x1xf32, #tpu.memory_space<vmem>>) attributes {dimension_semantics = [#tpu.dimension_semantics<parallel>, #tpu.dimension_semantics<arbitrary>], iteration_bounds = array<i64: 2, 2>, scalar_prefetch = 0 : i64, scratch_operands = 1 : i64, tpu.core_type = #tpu.core_type<tc>, window_params = [{transform_indices = @transform_0, window_bounds = array<i64: 1, 8, 128>}, {pipeline_mode = #tpu.pipeline_mode<synchronous>, transform_indices = @transform_1, window_bounds = array<i64: 128, 1>}, {pipeline_mode = #tpu.pipeline_mode<synchronous>, transform_indices = @transform_2, window_bounds = array<i64: 2, 8>}, {pipeline_mode = #tpu.pipeline_mode<synchronous>, transform_indices = @transform_3, window_bounds = array<i64: 8, 2>}, {pipeline_mode = #tpu.pipeline_mode<synchronous>, transform_indices = @transform_4, window_bounds = array<i64: 2, 1>}, {transform_indices = @transform_5, window_bounds = array<i64: 1, 8, 1>}]} {
    %c0_i32 = arith.constant 0 : i32
    %0 = arith.cmpi eq, %arg1, %c0_i32 : i32
    %1 = arith.extui %0 : i1 to i32
    %c0_i32_0 = arith.constant 0 : i32
    %2 = arith.cmpi ne, %1, %c0_i32_0 : i32
    scf.if %2 {
      %cst_11 = arith.constant 0.000000e+00 : f32
      %20 = vector.broadcast %cst_11 : f32 to vector<8x1xf32>
      %c0_12 = arith.constant 0 : index
      %c0_13 = arith.constant 0 : index
      %21 = vector.load %arg8[%c0_12, %c0_13] : memref<8x1xf32, #tpu.memory_space<vmem>>, vector<8x1xf32>
      tpu.vector_store %arg8[%c0_12, %c0_13], %20 {strides = array<i32>} : memref<8x1xf32, #tpu.memory_space<vmem>>, vector<8x1xf32>,
    } else {
    }
    %c0 = arith.constant 0 : index
    %c0_1 = arith.constant 0 : index
    %c0_2 = arith.constant 0 : index
    %3 = vector.load %arg2[%c0, %c0_1, %c0_2] : memref<1x8x128xbf16, #tpu.memory_space<vmem>>, vector<1x8x128xbf16>
    %4 = vector.shape_cast %3 : vector<1x8x128xbf16> to vector<8x128xbf16>
    %5 = tpu.iota {dimensions = array<i32: 1>} : vector<8x128xi32>
    %c128_i32 = arith.constant 128 : i32
    %6 = arith.muli %arg1, %c128_i32 : i32
    %c256_i32 = arith.constant 256 : i32
    %7 = arith.subi %c256_i32, %6 : i32
    %8 = vector.broadcast %7 : i32 to vector<8x128xi32>
    %9 = arith.cmpi slt, %5, %8 : vector<8x128xi32>
    %cst = arith.constant 0.000000e+00 : bf16
    %10 = vector.broadcast %cst : bf16 to vector<8x128xbf16>
    %11 = arith.select %9, %4, %10 : vector<8x128xi1>, vector<8x128xbf16>
    %c0_3 = arith.constant 0 : index
    %c0_4 = arith.constant 0 : index
    %12 = vector.load %arg8[%c0_3, %c0_4] : memref<8x1xf32, #tpu.memory_space<vmem>>, vector<8x1xf32>
    %c0_5 = arith.constant 0 : index
    %c0_6 = arith.constant 0 : index
    %13 = vector.load %arg3[%c0_5, %c0_6] : memref<128x1xbf16, #tpu.memory_space<vmem>>, vector<128x1xbf16>
    %cst_7 = arith.constant dense<0.000000e+00> : vector<8x1xf32>
    %14 = tpu.matmul %11, %13, %cst_7 {dimension_numbers = #tpu.dot_dimension_numbers<[1], [0], [0], [1], [0, 0, 1, 1], [], []>} : vector<8x128xbf16>, vector<128x1xbf16>, vector<8x1xf32> -> vector<8x1xf32>
    %15 = arith.addf %12, %14 : vector<8x1xf32>
    %c0_8 = arith.constant 0 : index
    %c0_9 = arith.constant 0 : index
    %16 = vector.load %arg8[%c0_8, %c0_9] : memref<8x1xf32, #tpu.memory_space<vmem>>, vector<8x1xf32>
    tpu.vector_store %arg8[%c0_8, %c0_9], %15 {strides = array<i32>} : memref<8x1xf32, #tpu.memory_space<vmem>>, vector<8x1xf32>,
    %c1_i32 = arith.constant 1 : i32
    %17 = arith.cmpi eq, %arg1, %c1_i32 : i32
    %18 = arith.extui %17 : i1 to i32
    %c0_i32_10 = arith.constant 0 : i32
    %19 = arith.cmpi ne, %18, %c0_i32_10 : i32
    scf.if %19 {
      %c0_11 = arith.constant 0 : index
      %c0_12 = arith.constant 0 : index
      %20 = vector.load %arg8[%c0_11, %c0_12] : memref<8x1xf32, #tpu.memory_space<vmem>>, vector<8x1xf32>
      %cst_13 = arith.constant 3.906250e-03 : f32
      %21 = vector.broadcast %cst_13 : f32 to vector<8x1xf32>
      %22 = arith.mulf %20, %21 : vector<8x1xf32>
      %c0_14 = arith.constant 0 : index
      %c0_15 = arith.constant 0 : index
      %23 = vector.load %arg4[%c0_14, %c0_15] : memref<2x8xbf16, #tpu.memory_space<vmem>>, vector<2x8xbf16>
      %c0_16 = arith.constant 0 : index
      %c0_17 = arith.constant 0 : index
      %24 = vector.load %arg5[%c0_16, %c0_17] : memref<8x2xbf16, #tpu.memory_space<vmem>>, vector<8x2xbf16>
      %c0_18 = arith.constant 0 : index
      %c0_19 = arith.constant 0 : index
      %25 = vector.load %arg6[%c0_18, %c0_19] : memref<2x1xf32, #tpu.memory_space<vmem>>, vector<2x1xf32>
      %26 = arith.truncf %22 : vector<8x1xf32> to vector<8x1xbf16>
      %cst_20 = arith.constant dense<0.000000e+00> : vector<2x1xf32>
      %27 = tpu.matmul %23, %26, %cst_20 {dimension_numbers = #tpu.dot_dimension_numbers<[1], [0], [0], [1], [0, 0, 1, 1], [], []>} : vector<2x8xbf16>, vector<8x1xbf16>, vector<2x1xf32> -> vector<2x1xf32>
      %28 = arith.addf %27, %25 : vector<2x1xf32>
      %cst_21 = arith.constant 0.000000e+00 : f32
      %29 = vector.broadcast %cst_21 : f32 to vector<2x1xf32>
      %30 = arith.maximumf %28, %29 : vector<2x1xf32>
      %31 = arith.truncf %30 : vector<2x1xf32> to vector<2x1xbf16>
      %cst_22 = arith.constant dense<0.000000e+00> : vector<8x1xf32>
      %32 = tpu.matmul %24, %31, %cst_22 {dimension_numbers = #tpu.dot_dimension_numbers<[1], [0], [0], [1], [0, 0, 1, 1], [], []>} : vector<8x2xbf16>, vector<2x1xbf16>, vector<8x1xf32> -> vector<8x1xf32>
      %cst_23 = arith.constant 3.000000e+00 : f32
      %33 = vector.broadcast %cst_23 : f32 to vector<8x1xf32>
      %34 = arith.addf %32, %33 : vector<8x1xf32>
      %cst_24 = arith.constant 0.000000e+00 : f32
      %cst_25 = arith.constant 6.000000e+00 : f32
      %35 = vector.broadcast %cst_24 : f32 to vector<8x1xf32>
      %36 = arith.maximumf %35, %34 : vector<8x1xf32>
      %37 = vector.broadcast %cst_25 : f32 to vector<8x1xf32>
      %38 = arith.minimumf %37, %36 : vector<8x1xf32>
      %cst_26 = arith.constant 0.166666672 : f32
      %39 = vector.broadcast %cst_26 : f32 to vector<8x1xf32>
      %40 = arith.mulf %38, %39 : vector<8x1xf32>
      %41 = vector.shape_cast %40 : vector<8x1xf32> to vector<1x8x1xf32>
      %c0_27 = arith.constant 0 : index
      %c0_28 = arith.constant 0 : index
      %c0_29 = arith.constant 0 : index
      %42 = vector.load %arg7[%c0_27, %c0_28, %c0_29] : memref<1x8x1xf32, #tpu.memory_space<vmem>>, vector<1x8x1xf32>
      tpu.vector_store %arg7[%c0_27, %c0_28, %c0_29], %41 {strides = array<i32>} : memref<1x8x1xf32, #tpu.memory_space<vmem>>, vector<1x8x1xf32>,
    } else {
    }
    return
  }
  func.func @transform_0(%arg0: i32, %arg1: i32) -> (i32, i32, i32) {
    %c0_i32 = arith.constant 0 : i32
    %c0_i32_0 = arith.constant 0 : i32
    return %arg0, %c0_i32, %arg1 : i32, i32, i32
  }
  func.func @transform_1(%arg0: i32, %arg1: i32) -> (i32, i32) {
    %c0_i32 = arith.constant 0 : i32
    %c0_i32_0 = arith.constant 0 : i32
    %c0_i32_1 = arith.constant 0 : i32
    return %c0_i32, %c0_i32_0 : i32, i32
  }
  func.func @transform_2(%arg0: i32, %arg1: i32) -> (i32, i32) {
    %c0_i32 = arith.constant 0 : i32
    %c0_i32_0 = arith.constant 0 : i32
    %c0_i32_1 = arith.constant 0 : i32
    return %c0_i32, %c0_i32_0 : i32, i32
  }
  func.func @transform_3(%arg0: i32, %arg1: i32) -> (i32, i32) {
    %c0_i32 = arith.constant 0 : i32
    %c0_i32_0 = arith.constant 0 : i32
    %c0_i32_1 = arith.constant 0 : i32
    return %c0_i32, %c0_i32_0 : i32, i32
  }
  func.func @transform_4(%arg0: i32, %arg1: i32) -> (i32, i32) {
    %c0_i32 = arith.constant 0 : i32
    %c0_i32_0 = arith.constant 0 : i32
    %c0_i32_1 = arith.constant 0 : i32
    return %c0_i32, %c0_i32_0 : i32, i32
  }
  func.func @transform_5(%arg0: i32, %arg1: i32) -> (i32, i32, i32) {
    %c0_i32 = arith.constant 0 : i32
    %c0_i32_0 = arith.constant 0 : i32
    %c0_i32_1 = arith.constant 0 : i32
    return %arg0, %c0_i32, %c0_i32_0 : i32, i32, i32
  }
}

</mosaic_0001>

<bundles_post_ra>
// kernel: tpu_custom_call.1
= control target key start
LH: loop header
LB: loop body
LE: loop exit
PB: predicated region body
PF: predicated region fallthrough
CT: control target
= control target key end

     0   :  { %s638_s18 = smov 0   ;;  %s640_s19 = smov 0   ;;  %s734_s0 = inlined_call_operand.vmem [shape: bf16[2,8,256], index: 0, kind: input, shape index: {}]   ;;  %s735_s1 = inlined_call_operand.vmem [shape: bf16[128,1], index: 1, kind: input, shape index: {}]   ;;  %s736_s2 = inlined_call_operand.vmem [shape: bf16[2,8], index: 2, kind: input, shape index: {}]   ;;  %s737_s3 = inlined_call_operand.vmem [shape: bf16[8,2], index: 3, kind: input, shape index: {}]   ;;  %s738_s4 = inlined_call_operand.vmem [shape: f32[2,1], index: 4, kind: input, shape index: {}]   ;;  %s739_s5 = inlined_call_operand.vmem [shape: f32[2,8,1], index: 5, kind: output, shape index: {}]  }
   0x1   :  { %s642_s20 = smov 0   ;;  %s644_s21 = smov 0  }
   0x2   :  { %s646_s22 = smov 0  }
   0x3 LB: > { %s24_s23 = sadd.s32 1, %s597_s20  ;;  %s27_s24 = sadd.s32 1, %s601_s21  ;;  %s605_s22 = sphi %s646_s22, %s15_s22   ;;  %s601_s21 = sphi %s644_s21, %s743_s21   ;;  %s597_s20 = sphi %s642_s20, %s742_s20   ;;  %s593_s19 = sphi %s640_s19, %s741_s19   ;;  %s589_s18 = sphi %s638_s18, %s740_s18  }
   0x4   : > { %p25_p0 = scmp.ge.s32.totalorder %s24_s23, 2  ;;  %p475_p1 = scmp.ge.s32.totalorder %s605_s22, 1 }
   0x5   : > { %p204_p2 = scmp.lt.s32.totalorder %s605_s22, 5 }
   0x6   : > { %s745_s23 = smov (%p25_p0, %s24_s23), 0  ;;  %s747_s24 = smov (!%p25_p0, %s27_s24), %s601_s21 }
   0x7   : > { %p205_p3 = pnand %p475_p1, %p204_p2  ;;  %p29_p4 = scmp.ge.s32.totalorder %s747_s24, 2 }
   0x8   : > { %p234_p5 = scmp.lt.s32.totalorder (!%p205_p3), %s593_s19, 1  ;;  %p236_p6 = scmp.lt.s32.totalorder (!%p205_p3), %s589_s18, 1 }
   0x9   : > { %s749_s24 = smov (%p29_p4, %s747_s24), 0  ;;  %208 = sbr.rel (%p205_p3) target bundleno = 472 (0x1d8), region = 40 }
   0xa   : > { %p479_p7 = scmp.ne.s32.totalorder (!%p205_p3), %s589_s18, 0 }
   0xe   : > { %s751_s19 = smov (!%p234_p5, %s593_s19), 1 }
   0xf   : > { %s237_s25 = scalar_select %p236_p6, %s589_s18, 1 }
  0x10   : > { %s476_s26 = sshll.u32 %s751_s19, 1  ;;  %s478_s27 = sshll.u32 %s751_s19, 3 }
  0x11   : > { %s239_s28 = sadd.s32 %s476_s26, %s237_s25  ;;  %s675_s6 = scalar_lea.vmem %s739_s5, %s478_s27 }
  0x12   : > { %s477_s7 = sshll.u32 %s239_s28, 2  ;;  %250 = sbr.rel (%p479_p7) target bundleno = 25 (0x19), region = 44 }
  0x13   : > { %s241_s10 = scalar_lea.vmem %s734_s0, %s477_s7 }
  0x17   : > { %vm251_vm0 = vcmask 7168   ;;  %v607_v0 = vmov 0.0  }
  0x18   : > { %252 = vst.msk [vmem:[#allocation2] sm:$0xff] %vm251_vm0, %v607_v0 }
  0x19 PF: > { %v525_v1 = vld [vmem:[%s735_s1 + $0x38] sm:$0xff]  ;;  %v524_v2 = vld [vmem:[%s735_s1 + $0x30] sm:$0xff]  ;;  %v523_v3 = vld [vmem:[%s735_s1 + $0x28] sm:$0xff]  ;;  %s480_s27 = sshll.u32 %s589_s18, 7  ;;  %v254_v6 = vlaneseq  ;;  %vm341_vm3 = vcmask 7168   ;;  %p513_p8 = scmp.ne.s32.totalorder %s589_s18, 1 }
  0x1a   : > { %327 = vmatpush.bf16.msra.mxu0 %v525_v1  ;;  %v522_v4 = vld [vmem:[%s735_s1 + $0x20] sm:$0xff]  ;;  %v521_v5 = vld [vmem:[%s735_s1 + $0x18] sm:$0xff]  ;;  %v520_v7 = vld [vmem:[%s735_s1 + $0x10] sm:$0xff]  ;;  %s257_s30 = ssub.s32 256, %s480_s27 }
  0x1b   : > { %v255_v8 = vand.u32 127, %v254_v6  ;;  %v258_v9 = vstv %s257_s30  ;;  %v519_v10 = vld [vmem:[%s735_s1 + $0x8] sm:$0xff]  ;;  %v518_v11 = vld [vmem:[%s735_s1] sm:$0xff] }
  0x1c   : > { %v253_v12 = vld [vmem:[%s241_s10] sm:$0xf] }
  0x1d   : > { %vm259_vm1 = vcmp.lt.s32.totalorder %v255_v8, %v258_v9 }
  0x1e   : > { %328 = vmatpush.bf16.msra.mxu0 %v524_v2  ;;  %vm260_vm2 = vmpackc.low %vm259_vm1, %vm259_vm1 }
  0x1f   : > { %v261_v13 = vsel %vm260_vm2, %v253_v12, 0  ;;  %v262_v14 = vld [vmem:[#allocation2] sm:$0xff] }
  0x22   : > { %329 = vmatpush.bf16.msra.mxu0 %v523_v3 }
  0x26   : > { %330 = vmatpush.bf16.msra.mxu0 %v522_v4 }
  0x2a   : > { %331 = vmatpush.bf16.msra.mxu0 %v521_v5 }
  0x2e   : > { %332 = vmatpush.bf16.msra.mxu0 %v520_v7 }
  0x32   : > { %333 = vmatpush.bf16.msra.mxu0 %v519_v10 }
  0x36   : > { %334 = vmatpush.bf16.msra.mxu0 %v518_v11 }
  0x39   : > { %335 = vmatmul.bf16.vlgmr.msra.gmra.mxu0 %v261_v13 }
  0xb6   : > { %v336_v15 = vpop.f32.mrf.mxu0 }
  0xb7   : > { %v340_v16 = vadd.f32 %v336_v15, %v262_v14 }
  0xb9   : > { %342 = vst.msk [vmem:[#allocation2] sm:$0xff] %vm341_vm3, %v340_v16 }
  0xba   : > { %346 = sbr.rel (%p513_p8) target bundleno = 472 (0x1d8), region = 48 }
  0xbe   : > { %v338_v17 = vpop.f32.mrf.mxu0 }
  0xbf   : > { %vm357_vm4 = vcmask 1043456   ;;  %v349_v22 = vld [vmem:[%s736_s2] sm:$0x1]  ;;  %vm353_vm5 = vcmask 64512   ;;  %vm380_vm6 = vcmask 1040384   ;;  %vm376_vm7 = vcmask 15360  }
  0xc0   : > { %v347_v18 = vld [vmem:[#allocation2] sm:$0xff] }
  0xc1   : > { %v348_v19 = vmul.f32 0.00390625, %v347_v18  ;;  %v351_v23 = vld [vmem:[%s738_s4] sm:$0x3] }
  0xc2   : > { %v350_v30 = vld [vmem:[%s737_s3] sm:$0xf] }
  0xc3   : > { %v352_v20 = vpack.c.bf16 %v348_v19, %v348_v19 }
  0xc5   : > { %v359_v21 = vsel %vm357_vm4, %v352_v20, 0 }
  0xc6   : > { %368 = vmatpush.bf16.msra.mxu0 %v359_v21 }
  0xc9   : > { %514 = vmatmul.msk.bf16.vlgmr.msra.gmra.mxu0 %vm353_vm5, %v349_v22 }
 0x146   : > { %v370_v24 = vpop.f32.mrf.mxu0 }
 0x147   : > { %v371_v25 = vadd.f32 %v370_v24, %v351_v23 }
 0x149   : > { %v374_v26 = vmax.f32 %v371_v25, 0.0 }
 0x14b   : > { %v375_v27 = vpack.c.bf16 %v374_v26, %v374_v26 }
 0x14d   : > { %v382_v28 = vsel %vm380_vm6, %v375_v27, 0 }
 0x14e   : > { %v372_v29 = vpop.f32.mrf.mxu0  ;;  %391 = vmatpush.bf16.msra.mxu1 %v382_v28 }
 0x151   : > { %515 = vmatmul.msk.bf16.vlgmr.msra.gmra.mxu1 %vm376_vm7, %v350_v30 }
 0x1ce   : > { %v393_v31 = vpop.f32.mrf.mxu1 }
 0x1cf   : > { %v394_v32 = vadd.f32 3.0, %v393_v31 }
 0x1d1   : > { %v397_v33 = vmax.f32 %v394_v32, 0.0 }
 0x1d3   : > { %v398_v34 = vmin.f32 %v397_v33, 6.0 }
 0x1d5   : > { %v399_v35 = vmul.f32 0.16666667, %v398_v34 }
 0x1d6   : > { %v395_v36 = vpop.f32.mrf.mxu1 }
 0x1d7   : > { %400 = vst.msk [vmem:[%s675_s6] sm:$0xff] %vm341_vm3, %v399_v35 }
 0x1d8 PF: > { %s15_s22 = sadd.s32 1, %s605_s22   ;;  %s740_s18 = smov %s597_s20 }
 0x1d9   : > { %p12_p9 = scmp.ge.s32.totalorder %s15_s22, 6   ;;  %s741_s19 = smov %s601_s21 }
 0x1da   : > { %s742_s20 = smov %s745_s23  ;;  %s743_s21 = smov %s749_s24 }
 0x1db   :  { %14 = sbr.rel (!%p12_p9) target bundleno = 3 (0x3), region = 78 }

</bundles_post_ra>
